<compile_context>
chip_gen: v7x
topology: tpu7x:2x2x1
jax: 0.10.0
libtpu: 0.0.40
codegen_flags: <defaults>
</compile_context>

<pallas_src>
import functools

import jax
import jax.numpy as jnp
from jax import lax
from jax.experimental import pallas as pl
from jax.experimental.pallas import tpu as pltpu


# ---------------------------------------------------------------------------
# Kernel
# ---------------------------------------------------------------------------
def _cnn_rows_kernel(x_ref, w_ref, aux_ref, o_ref, *, L, stacked):
    """One block of R = bt*L flattened (batch*seq) rows, channel-last.

    x_ref   : (R, H)     input rows in compute dtype (R is a multiple of L)
    w_ref   : (3H, H)    stacked-K fused conv weight   (when `stacked`)
              (3, H, H)  per-tap fused conv weights    (otherwise)
    aux_ref : (3, H)     row 0: fused bias, row 1: LN gamma, row 2: LN beta (f32)
    o_ref   : (R, H)     output rows (out dtype)
    """
    x = x_ref[...]
    R, H = x.shape

    # +/-1 shifts along the sequence axis.  Static jnp.roll lowers to cheap
    # sublane slice+concat copies; the one-row masks reproduce the conv's zero
    # padding and also kill the wraparound / cross-sequence mixing of the
    # flattened batch rows (the block row count is a multiple of L).
    row = lax.broadcasted_iota(jnp.int32, (R, 1), 0)
    x_prev = jnp.where(row % L == 0, 0.0, jnp.roll(x, 1, axis=0))
    x_next = jnp.where(row % L == L - 1, 0.0, jnp.roll(x, -1, axis=0))

    # conv1(k=3) + conv2(k=1) fused (exact in eval mode: dropout is identity
    # and there is no nonlinearity between the convs).
    if stacked:
        # Single stacked-K MXU push: (R, 3H) @ (3H, H).  Only taken when
        # H % 128 == 0 so the lane concat is tile aligned.
        x_cat = jnp.concatenate([x_prev, x, x_next], axis=-1)        # (R, 3H)
        y = jnp.dot(x_cat, w_ref[...], preferred_element_type=jnp.float32)
    else:
        y = (jnp.dot(x_prev, w_ref[0], preferred_element_type=jnp.float32)
             + jnp.dot(x, w_ref[1], preferred_element_type=jnp.float32)
             + jnp.dot(x_next, w_ref[2], preferred_element_type=jnp.float32))
    y = y + aux_ref[0:1, :]                                           # fused bias

    # Dropout is identity in eval mode; residual + ReLU (f32).
    # TODO(synk): training-mode dropout (RNG masking between the convs) is not
    # implemented; it would also invalidate the conv2-into-conv1 fold.
    y = x.astype(jnp.float32) + jnp.maximum(y, 0.0)

    # LayerNorm over the channel axis (f32 statistics; rsqrt runs on the EUP).
    mean = jnp.mean(y, axis=-1, keepdims=True)
    var = jnp.mean(jnp.square(y - mean), axis=-1, keepdims=True)
    out = (y - mean) * lax.rsqrt(var + 1e-5) * aux_ref[1:2, :] + aux_ref[2:3, :]
    o_ref[...] = out.astype(o_ref.dtype)


# ---------------------------------------------------------------------------
# Parameter fusion (wrapper-side, done once)
# ---------------------------------------------------------------------------
def fuse_params(conv1_w, conv1_b, conv2_w, conv2_b, gamma, beta):
    """Fold conv2 (k=1) into conv1 (k=3).  PyTorch weight shapes in.  Exact in
    eval mode (dropout identity, no nonlinearity between the convs)."""
    hi = lax.Precision.HIGHEST
    w1_taps = jnp.transpose(conv1_w, (2, 1, 0))                  # (3, H, 2H): [k, c, o]
    w2 = jnp.transpose(conv2_w[:, :, 0], (1, 0))                 # (2H, H):    [o, h]
    wf = jnp.einsum("kco,oh->kch", w1_taps, w2, precision=hi)    # (3, H, H)
    bf = jnp.dot(conv1_b, w2, precision=hi) + conv2_b            # (H,)
    H = wf.shape[1]
    if H % 128 == 0:
        # Stacked-K form: one (3H, H) weight -> single MXU push with K = 3H.
        wf = jnp.concatenate([wf[0], wf[1], wf[2]], axis=0)
    aux = jnp.stack([bf, gamma, beta], axis=0).astype(jnp.float32)   # (3, H)
    return wf.astype(jnp.float32), aux
    # TODO(synk): for H not a multiple of 128, zero-pad H to 128 here (and mask
    # the pad lanes in the LN reductions) to get lane-dense stores + MXU fill.


def _choose_block_batch(B, L, H, in_itemsize, out_itemsize):
    """Sequences per block, sized by bytes (not rows): target a ~4 MiB input
    block (>=85% of the measured HBM roofline) while budgeting the FULL
    per-block VMEM working set at ~24 MiB so double-buffering still fits v7x's
    32 MiB default scoped VMEM, and keep >= 2 grid steps for v7x's 2 TCs."""
    def working_set_bytes(bt):
        R = bt * L
        x_blk = R * H * in_itemsize                          # input block
        o_blk = R * H * out_itemsize                         # output block
        inter = R * 3 * H * in_itemsize + 2 * R * H * 4      # stacked input + f32 temps
        wgt = 2 * (3 * H * H * in_itemsize + 3 * H * 4)      # weights + aux (2-buffered)
        return 2 * x_blk + 2 * o_blk + inter + wgt

    target_x_bytes = 4 << 20
    budget = 24 << 20
    per_seq = max(1, L * H * in_itemsize)
    bt = max(1, min(B, -(-target_x_bytes // per_seq)))
    while bt > 1 and working_set_bytes(bt) > budget:
        bt -= 1
    # v7x megacore: only >= 2 grid steps can be sharded across its 2 TensorCores.
    if B >= 2:
        bt = min(bt, max(1, B // 2))
    # Block second-minor dim must be a multiple of 8 unless it spans the array.
    if (bt * L) % 8 != 0:
        while bt < B and (bt * L) % 8 != 0:
            bt += 1
        if (bt * L) % 8 != 0:
            bt = B
    # TODO(synk): if a single sequence already exceeds the budget (huge L*H on
    # v7x), additionally tile inside the sequence with a +/-1-row halo.
    return bt


# ---------------------------------------------------------------------------
# Wrappers
# ---------------------------------------------------------------------------
def cnn_block_nlh(x_nlh, params, *,
                  compute_dtype=jnp.bfloat16, out_dtype=jnp.float32):
    """Channel-last perf entry point: (B, L, H) -> (B, L, H).

    Use this directly when the surrounding model stays channel-last (skips the
    two NCL<->NLH transpose passes of `cnn_block`, each a full HBM round trip).
    compute_dtype=bfloat16 (default) halves matmul input traffic and uses the
    bf16-native MXU on v5e/v6e/v7x; accumulation, the residual and LayerNorm
    stay in f32.  Pass out_dtype=bfloat16 when the consumer accepts it to also
    halve the writeback traffic.  Use compute_dtype=float32 for bit-tight
    agreement with the f32 reference."""
    B, L, H = x_nlh.shape
    wf, aux = params
    stacked = wf.ndim == 2

    x_rows = x_nlh.reshape(B * L, H).astype(compute_dtype)
    wf = wf.astype(compute_dtype)

    in_itemsize = jnp.dtype(compute_dtype).itemsize
    out_itemsize = jnp.dtype(out_dtype).itemsize
    bt = _choose_block_batch(B, L, H, in_itemsize, out_itemsize)
    R = bt * L                                    # rows per block (multiple of L)
    grid = (pl.cdiv(B * L, R),)
    # NB: if B % bt != 0 the last block's tail rows compute on unspecified VMEM
    # contents; the per-sequence masks keep them out of valid rows and the
    # out-of-bounds writeback is masked, so this is harmless.

    kernel = functools.partial(_cnn_rows_kernel, L=L, stacked=stacked)
    w_index_map = (lambda i: (0, 0)) if stacked else (lambda i: (0, 0, 0))

    cost = pl.CostEstimate(
        flops=int(2 * B * L * 3 * H * H + 12 * B * L * H),
        transcendentals=int(B * L),
        bytes_accessed=int(B * L * H * (in_itemsize + out_itemsize)
                           + wf.size * in_itemsize + aux.size * 4),
    )

    out_rows = pl.pallas_call(
        kernel,
        out_shape=jax.ShapeDtypeStruct((B * L, H), out_dtype),
        grid_spec=pltpu.PrefetchScalarGridSpec(
            num_scalar_prefetch=0,
            grid=grid,
            in_specs=[
                pl.BlockSpec((R, H), lambda i: (i, 0)),       # x rows
                pl.BlockSpec(wf.shape, w_index_map),          # fused conv weight(s)
                pl.BlockSpec((3, H), lambda i: (0, 0)),       # bias / gamma / beta
            ],
            out_specs=pl.BlockSpec((R, H), lambda i: (i, 0)),
        ),
        compiler_params=pltpu.CompilerParams(
            dimension_semantics=("parallel",),                # row tiles independent
            vmem_limit_bytes=32 * 1024 * 1024),
        cost_estimate=cost,
    )(x_rows, wf, aux)
    return out_rows.reshape(B, L, H)


def cnn_block(x_ncl, params, *, compute_dtype=jnp.bfloat16, out_dtype=jnp.float32):
    """Matches CNN_block.forward: input/output (B, H, L).  Prefer
    cnn_block_nlh in channel-last models to avoid the transpose HBM passes."""
    x_nlh = jnp.transpose(x_ncl, (0, 2, 1))                   # (B, L, H)
    out_nlh = cnn_block_nlh(x_nlh, params,
                            compute_dtype=compute_dtype, out_dtype=out_dtype)
    return jnp.transpose(out_nlh, (0, 2, 1))                  # back to (B, H, L)


# ---------------------------------------------------------------------------
# Pure-JAX reference (eval mode), for validation
# ---------------------------------------------------------------------------
def reference(x_ncl, conv1_w, conv1_b, conv2_w, conv2_b, gamma, beta):
    hi = lax.Precision.HIGHEST
    y = lax.conv_general_dilated(
        x_ncl, conv1_w, window_strides=(1,), padding=[(1, 1)],
        dimension_numbers=("NCH", "OIH", "NCH"), precision=hi) + conv1_b[None, :, None]
    y = lax.conv_general_dilated(
        y, conv2_w, window_strides=(1,), padding=[(0, 0)],
        dimension_numbers=("NCH", "OIH", "NCH"), precision=hi) + conv2_b[None, :, None]
    y = x_ncl + jnp.maximum(y, 0.0)
    y = jnp.transpose(y, (0, 2, 1))                           # (B, L, H)
    mean = jnp.mean(y, axis=-1, keepdims=True)
    var = jnp.mean((y - mean) ** 2, axis=-1, keepdims=True)
    y = (y - mean) * lax.rsqrt(var + 1e-5) * gamma + beta
    return jnp.transpose(y, (0, 2, 1))                        # (B, H, L)


if __name__ == "__main__":
    B, H, L = 2, 32, 16          # batch, hidden_size (channels), sequence length
    H2 = 2 * H

    key = jax.random.PRNGKey(0)
    k_x, k_w1, k_b1, k_w2, k_b2 = jax.random.split(key, 5)

    x = jax.random.normal(k_x, (B, H, L), dtype=jnp.float32)          # NCL

    # Deterministic synthetic parameters (PyTorch shapes).
    conv1_w = jax.random.normal(k_w1, (H2, H, 3), dtype=jnp.float32) * 0.05
    conv1_b = jax.random.normal(k_b1, (H2,), dtype=jnp.float32) * 0.05
    conv2_w = jax.random.normal(k_w2, (H, H2, 1), dtype=jnp.float32) * 0.05
    conv2_b = jax.random.normal(k_b2, (H,), dtype=jnp.float32) * 0.05
    gamma = jnp.ones((H,), dtype=jnp.float32)
    beta = jnp.zeros((H,), dtype=jnp.float32)

    params = fuse_params(conv1_w, conv1_b, conv2_w, conv2_b, gamma, beta)
    ref = reference(x, conv1_w, conv1_b, conv2_w, conv2_b, gamma, beta)

    # Exact-ish path: f32 matmul inputs.
    out_f32 = jax.block_until_ready(
        cnn_block(x, params, compute_dtype=jnp.float32))
    assert out_f32.shape == (B, H, L)
    assert jnp.allclose(out_f32, ref, atol=1e-3, rtol=1e-3), "f32 path mismatch"

    # Default perf path: bf16 matmul inputs (f32 accumulation / LN / output).
    out_bf16 = jax.block_until_ready(cnn_block(x, params))
    assert out_bf16.shape == (B, H, L)
    assert jnp.allclose(out_bf16, ref, atol=1e-1, rtol=1e-1), "bf16 path mismatch"

    print("KERNEL_OK")
</pallas_src>

<mosaic_0001>
module attributes {stable_mosaic.version = 11 : i64} {
  func.func @_cnn_rows_kernel(%arg0: i32, %arg1: memref<16x32xf32, #tpu.memory_space<vmem>>, %arg2: memref<3x32x32xf32, #tpu.memory_space<vmem>>, %arg3: memref<3x32xf32, #tpu.memory_space<vmem>>, %arg4: memref<16x32xf32, #tpu.memory_space<vmem>>) attributes {dimension_semantics = [#tpu.dimension_semantics<parallel>], iteration_bounds = array<i64: 2>, scalar_prefetch = 0 : i64, scratch_operands = 0 : i64, tpu.core_type = #tpu.core_type<tc>, window_params = [{transform_indices = @transform_0, window_bounds = array<i64: 16, 32>}, {pipeline_mode = #tpu.pipeline_mode<synchronous>, transform_indices = @transform_1, window_bounds = array<i64: 3, 32, 32>}, {pipeline_mode = #tpu.pipeline_mode<synchronous>, transform_indices = @transform_2, window_bounds = array<i64: 3, 32>}, {transform_indices = @transform_3, window_bounds = array<i64: 16, 32>}]} {
    %c0 = arith.constant 0 : index
    %c0_0 = arith.constant 0 : index
    %0 = vector.load %arg1[%c0, %c0_0] : memref<16x32xf32, #tpu.memory_space<vmem>>, vector<16x32xf32>
    %1 = tpu.iota {dimensions = array<i32: 0>} : vector<16x1xi32>
    %c16_i32 = arith.constant 16 : i32
    %c0_i32 = arith.constant 0 : i32
    %2 = arith.cmpi eq, %c16_i32, %c0_i32 : i32
    %c1_i32 = arith.constant 1 : i32
    %3 = arith.select %2, %c1_i32, %c16_i32 : i32
    %4 = vector.broadcast %3 : i32 to vector<16x1xi32>
    %5 = arith.remsi %1, %4 : vector<16x1xi32>
    %c0_i32_1 = arith.constant 0 : i32
    %6 = vector.broadcast %c0_i32_1 : i32 to vector<16x1xi32>
    %7 = arith.cmpi ne, %5, %6 : vector<16x1xi32>
    %c0_i32_2 = arith.constant 0 : i32
    %8 = vector.broadcast %c0_i32_2 : i32 to vector<16x1xi32>
    %9 = arith.cmpi slt, %5, %8 : vector<16x1xi32>
    %c0_i32_3 = arith.constant 0 : i32
    %10 = arith.cmpi slt, %3, %c0_i32_3 : i32
    %11 = vector.broadcast %10 : i1 to vector<16x1xi1>
    %12 = vector.broadcast %11 : vector<16x1xi1> to vector<16x1xi1>
    %13 = arith.xori %9, %12 : vector<16x1xi1>
    %14 = arith.andi %13, %7 : vector<16x1xi1>
    %15 = vector.broadcast %3 : i32 to vector<16x1xi32>
    %16 = arith.addi %5, %15 : vector<16x1xi32>
    %17 = arith.select %14, %16, %5 : vector<16x1xi1>, vector<16x1xi32>
    %c0_i32_4 = arith.constant 0 : i32
    %18 = vector.broadcast %c0_i32_4 : i32 to vector<16x1xi32>
    %19 = arith.cmpi eq, %17, %18 : vector<16x1xi32>
    %20 = vector.extract_strided_slice %0 {offsets = [15, 0], sizes = [1, 32], strides = [1, 1]} : vector<16x32xf32> to vector<1x32xf32>
    %21 = vector.extract_strided_slice %0 {offsets = [0, 0], sizes = [15, 32], strides = [1, 1]} : vector<16x32xf32> to vector<15x32xf32>
    %22 = tpu.concatenate %20, %21 in 0 : vector<1x32xf32>, vector<15x32xf32> -> vector<16x32xf32>
    %cst = arith.constant 0.000000e+00 : f32
    %23 = vector.shape_cast %19 : vector<16x1xi1> to vector<16x1xi1>
    %24 = vector.broadcast %23 : vector<16x1xi1> to vector<16x32xi1>
    %25 = vector.broadcast %cst : f32 to vector<16x32xf32>
    %26 = arith.select %24, %25, %22 : vector<16x32xi1>, vector<16x32xf32>
    %c16_i32_5 = arith.constant 16 : i32
    %c0_i32_6 = arith.constant 0 : i32
    %27 = arith.cmpi eq, %c16_i32_5, %c0_i32_6 : i32
    %c1_i32_7 = arith.constant 1 : i32
    %28 = arith.select %27, %c1_i32_7, %c16_i32_5 : i32
    %29 = vector.broadcast %28 : i32 to vector<16x1xi32>
    %30 = arith.remsi %1, %29 : vector<16x1xi32>
    %c0_i32_8 = arith.constant 0 : i32
    %31 = vector.broadcast %c0_i32_8 : i32 to vector<16x1xi32>
    %32 = arith.cmpi ne, %30, %31 : vector<16x1xi32>
    %c0_i32_9 = arith.constant 0 : i32
    %33 = vector.broadcast %c0_i32_9 : i32 to vector<16x1xi32>
    %34 = arith.cmpi slt, %30, %33 : vector<16x1xi32>
    %c0_i32_10 = arith.constant 0 : i32
    %35 = arith.cmpi slt, %28, %c0_i32_10 : i32
    %36 = vector.broadcast %35 : i1 to vector<16x1xi1>
    %37 = vector.broadcast %36 : vector<16x1xi1> to vector<16x1xi1>
    %38 = arith.xori %34, %37 : vector<16x1xi1>
    %39 = arith.andi %38, %32 : vector<16x1xi1>
    %40 = vector.broadcast %28 : i32 to vector<16x1xi32>
    %41 = arith.addi %30, %40 : vector<16x1xi32>
    %42 = arith.select %39, %41, %30 : vector<16x1xi1>, vector<16x1xi32>
    %c15_i32 = arith.constant 15 : i32
    %43 = vector.broadcast %c15_i32 : i32 to vector<16x1xi32>
    %44 = arith.cmpi eq, %42, %43 : vector<16x1xi32>
    %45 = vector.extract_strided_slice %0 {offsets = [1, 0], sizes = [15, 32], strides = [1, 1]} : vector<16x32xf32> to vector<15x32xf32>
    %46 = vector.extract_strided_slice %0 {offsets = [0, 0], sizes = [1, 32], strides = [1, 1]} : vector<16x32xf32> to vector<1x32xf32>
    %47 = tpu.concatenate %45, %46 in 0 : vector<15x32xf32>, vector<1x32xf32> -> vector<16x32xf32>
    %cst_11 = arith.constant 0.000000e+00 : f32
    %48 = vector.shape_cast %44 : vector<16x1xi1> to vector<16x1xi1>
    %49 = vector.broadcast %48 : vector<16x1xi1> to vector<16x32xi1>
    %50 = vector.broadcast %cst_11 : f32 to vector<16x32xf32>
    %51 = arith.select %49, %50, %47 : vector<16x32xi1>, vector<16x32xf32>
    %c0_12 = arith.constant 0 : index
    %c0_13 = arith.constant 0 : index
    %c0_14 = arith.constant 0 : index
    %52 = vector.load %arg2[%c0_12, %c0_13, %c0_14] : memref<3x32x32xf32, #tpu.memory_space<vmem>>, vector<1x32x32xf32>
    %53 = vector.shape_cast %52 : vector<1x32x32xf32> to vector<32x32xf32>
    %cst_15 = arith.constant dense<0.000000e+00> : vector<16x32xf32>
    %54 = tpu.matmul %26, %53, %cst_15 {dimension_numbers = #tpu.dot_dimension_numbers<[1], [0], [0], [1], [0, 0, 1, 1], [], []>} : vector<16x32xf32>, vector<32x32xf32>, vector<16x32xf32> -> vector<16x32xf32>
    %c1 = arith.constant 1 : index
    %c0_16 = arith.constant 0 : index
    %c0_17 = arith.constant 0 : index
    %55 = vector.load %arg2[%c1, %c0_16, %c0_17] : memref<3x32x32xf32, #tpu.memory_space<vmem>>, vector<1x32x32xf32>
    %56 = vector.shape_cast %55 : vector<1x32x32xf32> to vector<32x32xf32>
    %cst_18 = arith.constant dense<0.000000e+00> : vector<16x32xf32>
    %57 = tpu.matmul %0, %56, %cst_18 {dimension_numbers = #tpu.dot_dimension_numbers<[1], [0], [0], [1], [0, 0, 1, 1], [], []>} : vector<16x32xf32>, vector<32x32xf32>, vector<16x32xf32> -> vector<16x32xf32>
    %58 = arith.addf %54, %57 : vector<16x32xf32>
    %c2 = arith.constant 2 : index
    %c0_19 = arith.constant 0 : index
    %c0_20 = arith.constant 0 : index
    %59 = vector.load %arg2[%c2, %c0_19, %c0_20] : memref<3x32x32xf32, #tpu.memory_space<vmem>>, vector<1x32x32xf32>
    %60 = vector.shape_cast %59 : vector<1x32x32xf32> to vector<32x32xf32>
    %cst_21 = arith.constant dense<0.000000e+00> : vector<16x32xf32>
    %61 = tpu.matmul %51, %60, %cst_21 {dimension_numbers = #tpu.dot_dimension_numbers<[1], [0], [0], [1], [0, 0, 1, 1], [], []>} : vector<16x32xf32>, vector<32x32xf32>, vector<16x32xf32> -> vector<16x32xf32>
    %62 = arith.addf %58, %61 : vector<16x32xf32>
    %c0_22 = arith.constant 0 : index
    %c0_23 = arith.constant 0 : index
    %63 = vector.load %arg3[%c0_22, %c0_23] : memref<3x32xf32, #tpu.memory_space<vmem>>, vector<1x32xf32>
    %64 = vector.broadcast %63 : vector<1x32xf32> to vector<16x32xf32>
    %65 = arith.addf %62, %64 : vector<16x32xf32>
    %cst_24 = arith.constant 0.000000e+00 : f32
    %66 = vector.broadcast %cst_24 : f32 to vector<16x32xf32>
    %67 = arith.maximumf %65, %66 : vector<16x32xf32>
    %68 = arith.addf %0, %67 : vector<16x32xf32>
    %cst_25 = arith.constant dense<0.000000e+00> : vector<16xf32>
    %69 = vector.multi_reduction <add>, %68, %cst_25 [1] : vector<16x32xf32> to vector<16xf32>
    %70 = vector.shape_cast %69 : vector<16xf32> to vector<16x1xf32>
    %cst_26 = arith.constant 3.200000e+01 : f32
    %71 = vector.broadcast %cst_26 : f32 to vector<16x1xf32>
    %72 = arith.divf %70, %71 : vector<16x1xf32>
    %73 = vector.broadcast %72 : vector<16x1xf32> to vector<16x32xf32>
    %74 = arith.subf %68, %73 : vector<16x32xf32>
    %75 = arith.mulf %74, %74 : vector<16x32xf32>
    %cst_27 = arith.constant dense<0.000000e+00> : vector<16xf32>
    %76 = vector.multi_reduction <add>, %75, %cst_27 [1] : vector<16x32xf32> to vector<16xf32>
    %77 = vector.shape_cast %76 : vector<16xf32> to vector<16x1xf32>
    %cst_28 = arith.constant 3.200000e+01 : f32
    %78 = vector.broadcast %cst_28 : f32 to vector<16x1xf32>
    %79 = arith.divf %77, %78 : vector<16x1xf32>
    %80 = vector.broadcast %72 : vector<16x1xf32> to vector<16x32xf32>
    %81 = arith.subf %68, %80 : vector<16x32xf32>
    %cst_29 = arith.constant 9.99999974E-6 : f32
    %82 = vector.broadcast %cst_29 : f32 to vector<16x1xf32>
    %83 = arith.addf %79, %82 : vector<16x1xf32>
    %84 = math.rsqrt %83 : vector<16x1xf32>
    %85 = vector.broadcast %84 : vector<16x1xf32> to vector<16x32xf32>
    %86 = arith.mulf %81, %85 : vector<16x32xf32>
    %c1_30 = arith.constant 1 : index
    %c0_31 = arith.constant 0 : index
    %87 = vector.load %arg3[%c1_30, %c0_31] : memref<3x32xf32, #tpu.memory_space<vmem>>, vector<1x32xf32>
    %88 = vector.broadcast %87 : vector<1x32xf32> to vector<16x32xf32>
    %89 = arith.mulf %86, %88 : vector<16x32xf32>
    %c2_32 = arith.constant 2 : index
    %c0_33 = arith.constant 0 : index
    %90 = vector.load %arg3[%c2_32, %c0_33] : memref<3x32xf32, #tpu.memory_space<vmem>>, vector<1x32xf32>
    %91 = vector.broadcast %90 : vector<1x32xf32> to vector<16x32xf32>
    %92 = arith.addf %89, %91 : vector<16x32xf32>
    %c0_34 = arith.constant 0 : index
    %c0_35 = arith.constant 0 : index
    %93 = vector.load %arg4[%c0_34, %c0_35] : memref<16x32xf32, #tpu.memory_space<vmem>>, vector<16x32xf32>
    tpu.vector_store %arg4[%c0_34, %c0_35], %92 {strides = array<i32>} : memref<16x32xf32, #tpu.memory_space<vmem>>, vector<16x32xf32>,
    return
  }
  func.func @transform_0(%arg0: i32) -> (i32, i32) {
    %c0_i32 = arith.constant 0 : i32
    %c0_i32_0 = arith.constant 0 : i32
    return %arg0, %c0_i32 : i32, i32
  }
  func.func @transform_1(%arg0: i32) -> (i32, i32, i32) {
    %c0_i32 = arith.constant 0 : i32
    %c0_i32_0 = arith.constant 0 : i32
    %c0_i32_1 = arith.constant 0 : i32
    %c0_i32_2 = arith.constant 0 : i32
    return %c0_i32, %c0_i32_0, %c0_i32_1 : i32, i32, i32
  }
  func.func @transform_2(%arg0: i32) -> (i32, i32) {
    %c0_i32 = arith.constant 0 : i32
    %c0_i32_0 = arith.constant 0 : i32
    %c0_i32_1 = arith.constant 0 : i32
    return %c0_i32, %c0_i32_0 : i32, i32
  }
  func.func @transform_3(%arg0: i32) -> (i32, i32) {
    %c0_i32 = arith.constant 0 : i32
    %c0_i32_0 = arith.constant 0 : i32
    return %arg0, %c0_i32 : i32, i32
  }
}

</mosaic_0001>

<bundles_post_ra>
// kernel: tpu_custom_call.1
= control target key start
LH: loop header
LB: loop body
LE: loop exit
PB: predicated region body
PF: predicated region fallthrough
CT: control target
= control target key end

     0   :  { %8 = vsyncpa [#allocation3], 0  ;;  %s1246_s0 = inlined_call_operand.hbm [shape: f32[32,32], index: 0, kind: input, shape index: {}]   ;;  %s1247_s1 = inlined_call_operand.hbm [shape: f32[3,32,32], index: 1, kind: input, shape index: {}]   ;;  %s1248_s2 = inlined_call_operand.vmem [shape: f32[3,32], index: 2, kind: input, shape index: {}]   ;;  %s1249_s3 = inlined_call_operand.hbm [shape: f32[32,32], index: 3, kind: output, shape index: {}]  }
   0x1   :  { %10 = vsyncpa [#allocation3 + $0x1], 0 }
   0x2   :  { %11 = vsyncpa [#allocation6], 0 }
   0x3   :  { %12 = vsyncpa [#allocation4], 0 }
   0x4   :  { %14 = vsyncpa [#allocation4 + $0x1], 0  ;;  %s1006_s12 = smov 0   ;;  %s1008_s13 = smov 0  }
   0x5   :  { %s1010_s14 = smov 0   ;;  %s1012_s15 = smov 0  }
   0x6 LB: > { %s1027_s16 = sadd.s32 4294967295, %s977_s15   ;;  %s678_s17 = sadd.s32 4294967294, %s977_s15   ;;  %s977_s15 = sphi %s1012_s15, %s1271_s15   ;;  %s973_s14 = sphi %s1010_s14, %s1270_s14   ;;  %s969_s13 = sphi %s1008_s13, %s1269_s13   ;;  %s965_s12 = sphi %s1006_s12, %s1268_s12  }
   0x7   : > { %p40_p0 = scmp.ne.s32.totalorder %s969_s13, %s965_s12  ;;  %p1250_p1 = scmp.eq.s32.totalorder %s1027_s16, 0 }
   0x8   : > { %p112_p3 = scmp.eq.s32.totalorder %s678_s17, 1  ;;  %p679_p5 = scmp.ge.s32.totalorder %s977_s15, 1 }
   0x9   : > { %p1036_p4 = por %p1250_p1, %p40_p0  ;;  %p119_p7 = scmp.lt.s32.totalorder %s977_s15, 3 }
   0xa   : > { %p1041_p6 = por %p112_p3, %p40_p0  ;;  %s979_s21 = smov [#allocation5]  }
   0xb   : > { %s1253_s18 = scalar_select %p1036_p4, 1, 0 }
   0xc   : > { %s1254_s19 = scalar_select %p1041_p6, 1, 0 }
   0xd   : > { %p1046_p8 = pnand %p679_p5, %p119_p7  ;;  %s131_s22 = sshll.u32 %s979_s21, 4  ;;  %s1050_s22 = int_to_ptr.vmem [resolvable:$true] %s131_s22 }
   0xe   : > { %s1062_s24 = sadd.s32 1, %s977_s15   ;;  %s27_s25 = sadd.s32 1, %s973_s14 }
   0xf   : > { %s1255_s20 = scalar_select %p1046_p8, 1, 0 }
  0x10   : > { %p792_p9 = pneg %p1046_p8  ;;  %s24_s26 = ssub.s32 %s977_s15, %s1062_s24 }
  0x11   : > { %s849_s29 = scalar_lea.hbm %s1247_s1, 1536 }
  0x12   : > { %p1057_p11 = pnand %p792_p9, %p1250_p1  ;;  %p850_p12 = scmp.ne.s32.totalorder %s1247_s1, %s849_s29 }
  0x13   : > { %p856_p5 = scmp.lt.u32.totalorder %s849_s29, %s1247_s1 }
  0x14   : > { %p851_p13 = pneg %p1057_p11 }
  0x16   : > { %p852_p0 = pnand %p851_p13, %p850_p12 }
  0x18   : > { %p853_p3 = pneg %p852_p0 }
  0x1a   : > { %p858_p7 = pnand %p856_p5, %p853_p3 }
  0x1c   : > { %861 = shalt.err (!%p858_p7)
}
  0x1d   : > { %s862_s7 = scalar_lea.vmem %s1050_s22, 1536  ;;  %p870_p2 = scmp.lt.s32.totalorder %s1050_s22, %s1050_s22 }
  0x1e   : > { %p863_p9 = scmp.ne.s32.totalorder %s1050_s22, %s862_s7  ;;  %p871_p6 = scmp.lt.s32.totalorder %s862_s7, %s862_s7 }
  0x20   : > { %p865_p10 = pnand %p863_p9, %p851_p13  ;;  %p872_p4 = por %p871_p6, %p870_p2 }
  0x22   : > { %p866_p1 = pneg %p865_p10 }
  0x24   : > { %p873_p8 = pnand %p872_p4, %p866_p1 }
  0x26   : > { %876 = shalt.err (!%p873_p8)
}
  0x27   : > { %s980_s8 = smov 128   ;;  %s981_s9 = smov 8  }
  0x28   : > { %795 = dma.hbm_to_vmem [thread:$0]  (!%p1057_p11), %s1247_s1, 1536, %s1050_s22, [#allocation6], %s980_s8, %s980_s8, %s981_s9  }
  0x29   : > { %p25_p1 = scmp.eq.s32.totalorder %s24_s26, 0  ;;  %p34_p2 = scmp.ne.s32.totalorder %s973_s14, %s969_s13 }
  0x2a   : > { %p35_p4 = scmp.eq.s32.totalorder %s977_s15, 0  ;;  %p805_p6 = scmp.lt.s32.totalorder %s977_s15, 2 }
  0x2b   : > { %s1096_s17 = scalar_select %p25_p1, %s973_s14, %s27_s25  }
  0x2c   : > { %p36_p8 = por %p35_p4, %p34_p2  ;;  %p1257_p10 = scmp.eq.s32.totalorder %s1027_s16, 1 }
  0x2d   : > { %s148_s23 = sand.u32 1, %s973_s14   ;;  %s703_s27 = sshll.u32 %s977_s15, 8 }
  0x2e   : > { %p1100_p12 = por %p1257_p10, %p34_p2  ;;  %s682_s28 = sshll.u32 %s148_s23, 4 }
  0x2f   : > { %s1109_s4 = scalar_lea.hbm %s1246_s0, %s703_s27  ;;  %s152_s22 = scalar_lea.vmem [#allocation2], %s682_s28 }
  0x30   : > { %s159_s25 = sshll.u32 %s152_s22, 4  ;;  %p1111_p11 = pnand %p805_p6, %p36_p8  ;;  %s1115_s25 = int_to_ptr.vmem [resolvable:$true] %s159_s25 }
  0x31   : > { %s1117_s5 = scalar_lea.sflag [#allocation3], %s148_s23  ;;  %s877_s6 = scalar_lea.hbm %s1109_s4, 256 }
  0x32   : > { %p878_p13 = scmp.ne.s32.totalorder %s1109_s4, %s877_s6  ;;  %p879_p0 = pneg %p1111_p11 }
  0x33   : > { %s882_s11 = scalar_lea.hbm %s1246_s0, 512  ;;  %p883_p7 = scmp.lt.u32.totalorder %s1109_s4, %s1246_s0 }
  0x34   : > { %p880_p3 = pnand %p879_p0, %p878_p13  ;;  %p884_p9 = scmp.lt.u32.totalorder %s882_s11, %s877_s6 }
  0x35   : > { %p886_p2 = scmp.lt.u32.totalorder %s877_s6, %s1109_s4 }
  0x36   : > { %p881_p5 = pneg %p880_p3  ;;  %p885_p1 = por %p884_p9, %p883_p7 }
  0x38   : > { %p887_p4 = por %p886_p2, %p885_p1 }
  0x3a   : > { %p888_p6 = pnand %p887_p4, %p881_p5 }
  0x3c   : > { %891 = shalt.err (!%p888_p6)
}
  0x3d   : > { %s892_s23 = scalar_lea.vmem %s1115_s25, 256  ;;  %s982_s29 = smov [#allocation2]  }
  0x3e   : > { %p893_p8 = scmp.ne.s32.totalorder %s1115_s25, %s892_s23  ;;  %s897_s30 = sshll.u32 %s982_s29, 4  ;;  %s898_s30 = int_to_ptr.vmem [resolvable:$false] %s897_s30 }
  0x3f   : > { %s899_s22 = scalar_lea.vmem %s898_s30, 512  ;;  %p900_p3 = scmp.lt.s32.totalorder %s1115_s25, %s898_s30 }
  0x40   : > { %p895_p10 = pnand %p893_p8, %p879_p0  ;;  %p901_p7 = scmp.lt.s32.totalorder %s899_s22, %s892_s23 }
  0x42   : > { %p896_p13 = pneg %p895_p10  ;;  %p902_p9 = por %p901_p7, %p900_p3 }
  0x44   : > { %p903_p1 = pnand %p902_p9, %p896_p13 }
  0x46   : > { %906 = shalt.err (!%p903_p1)
}
  0x47   : > { %799 = dma.hbm_to_vmem [thread:$0]  (!%p1111_p11), %s1109_s4, 256, %s1115_s25, %s1117_s5, %s980_s8, %s980_s8, %s981_s9  }
  0x48   : > { %p1260_p0 = scmp.ne.s32.totalorder %s1255_s20, 0 }
  0x49   : > { %s1151_s6 = sand.u32 (!%p1260_p0), 1, %s969_s13   ;;  %p1261_p5 = scmp.ne.s32.totalorder (!%p1260_p0), %s1253_s18, 0 }
  0x4a   : > { %171 = sbr.rel (%p1260_p0) target bundleno = 658 (0x292), region = 32  ;;  %s686_s7 = sshll.u32 (!%p1260_p0), %s1151_s6, 4 }
  0x4b   : > { %s174_s10 = scalar_lea.sflag (!%p1260_p0), [#allocation3], %s1151_s6  ;;  %s177_s26 = scalar_lea.vmem (!%p1260_p0), [#allocation2], %s686_s7 }
  0x51   : > { %952 = dma.done.wait (%p1261_p5), %s174_s10, 256  }
  0x52   : > { %954 = vsyncadd (%p1261_p5), %s174_s10, 4294967040  ;;  %p1262_p11 = scmp.eq.s32.totalorder %s1027_s16, 0 }
  0x54   : > { %956 = dma.done.wait (%p1262_p11), [#allocation6], 1536   ;;  %p1263_p2 = pmov %p1262_p11 }
  0x55   : > { %v208_v0 = vlaneseq  ;;  %v269_v3 = vld [vmem:[#allocation5] sm:$0xff]  ;;  %v270_v4 = vld [vmem:[#allocation5 + $0x8] sm:$0xff]  ;;  %v271_v5 = vld [vmem:[#allocation5 + $0x10] sm:$0xff]  ;;  %vm241_vm0 = vcmask 1040384   ;;  %vm278_vm1 = vcmask 261120   ;;  %vm255_vm3 = vcmask 1046528  }
  0x56   : > { %958 = vsyncadd (%p1263_p2), [#allocation6], 4294965760  ;;  %v764_v6 = vpack.c.bf16 %v270_v4, %v269_v3  ;;  %v272_v7 = vld [vmem:[#allocation5 + $0x18] sm:$0xff]  ;;  %v206_v8 = vld [vmem:[%s177_s26] sm:$0xff]  ;;  %s704_s5 = sshll.u32 %s1027_s16, 8  ;;  %s203_s11 = scalar_lea.vmem [#allocation7], %s686_s7 }
  0x57   : > { %v209_v1 = vshrl.u32 %v208_v0, 7  ;;  %v207_v9 = vld [vmem:[%s177_s26 + $0x8] sm:$0xff]  ;;  %v768_v10 = vpack.c.bf16 %v272_v7, %v271_v5  ;;  %v242_v13 = vrot.slane %v206_v8, 7  ;;  %v274_v14 = vld [vmem:[#allocation5 + $0x20] sm:$0xff]  ;;  %731 = vmatprep.mubr.msk.f32.mxu1 %vm278_vm1, %v206_v8  ;;  %v276_v19 = vld [vmem:[#allocation5 + $0x30] sm:$0xff]  ;;  %v256_v26 = vrot.slane %v206_v8, 1  ;;  %s1199_s29 = scalar_lea.hbm %s1249_s3, %s704_s5 }
  0x58   : > { %v238_v12 = vrot.slane %v207_v9, 7  ;;  %v275_v15 = vld [vmem:[#allocation5 + $0x28] sm:$0xff]  ;;  %v440_v16 = vld [vmem:[#allocation5 + $0x40] sm:$0xff]  ;;  %765 = vmatprep.subr.bf16.mxu0 %v764_v6  ;;  %v277_v20 = vld [vmem:[#allocation5 + $0x38] sm:$0xff]  ;;  %v257_v27 = vrot.slane %v207_v9, 1  ;;  %s595_s27 = sshll.u32 %s203_s11, 4  ;;  %s1201_s27 = int_to_ptr.vmem [resolvable:$true] %s595_s27 }
  0x59   : > { %v215_v2 = vand.u32 15, %v209_v1  ;;  %v756_v17 = vpack.c.bf16 %v275_v15, %v274_v14  ;;  %v441_v18 = vld [vmem:[#allocation5 + $0x48] sm:$0xff]  ;;  %767 = vmatpush3.bf16.msra.mxu0 %v764_v6  ;;  %v210_v21 = vadd.s32 8, %v209_v1  ;;  %v760_v23 = vpack.c.bf16 %v277_v20, %v276_v19  ;;  %v442_v28 = vld [vmem:[#allocation5 + $0x50] sm:$0xff]  ;;  %v443_v29 = vld [vmem:[#allocation5 + $0x58] sm:$0xff]  ;;  %s582_s16 = scalar_lea.sflag [#allocation4], %s1151_s6 }
  0x5a   : > { %v246_v22 = vsel %vm241_vm0, %v238_v12, %v242_v13  ;;  %769 = vmatprep.subr.bf16.mxu0 %v768_v10  ;;  %v772_v25 = vpack.c.bf16 %v441_v18, %v440_v16  ;;  %v243_v30 = vsel %vm241_vm0, %v242_v13, %v238_v12  ;;  %v776_v32 = vpack.c.bf16 %v443_v29, %v442_v28  ;;  %v695_v39 = vld [vmem:[%s1248_s2] ss:$0 sm:$0xff]  ;;  %v696_v4 = vld [vmem:[%s1248_s2 + $0x1] ss:$0 sm:$0xff]  ;;  %v697_v6 = vld [vmem:[%s1248_s2 + $0x2] ss:$0 sm:$0xff] }
  0x5b   : > { %vm1165_vm2 = vcmp.eq.s32.totalorder %v215_v2, 0  ;;  %757 = vmatprep.subr.bf16.mxu1 %v756_v17  ;;  %v222_v31 = vand.u32 15, %v210_v21  ;;  %v258_v33 = vsel %vm255_vm3, %v256_v26, %v257_v27  ;;  %v262_v34 = vsel %vm255_vm3, %v257_v27, %v256_v26  ;;  %s907_s30 = scalar_lea.vmem %s1201_s27, 256  ;;  %s983_s22 = smov [#allocation7]  }
  0x5c   : > { %v251_v24 = vsel %vm1165_vm2, 0.0, %v246_v22  ;;  %759 = vmatpush3.bf16.msra.mxu1 %v756_v17  ;;  %p908_p4 = scmp.ne.s32.totalorder %s1201_s27, %s907_s30  ;;  %s911_s7 = sshll.u32 %s983_s22, 4  ;;  %s912_s7 = int_to_ptr.vmem [resolvable:$false] %s911_s7 }
  0x5d   : > { %742 = vmatprep.mubr.msk.f32.mxu0 %vm278_vm1, %v251_v24  ;;  %761 = vmatprep.subr.bf16.mxu1 %v760_v23  ;;  %vm254_vm4 = vcmp.eq.s32.totalorder %v222_v31, 15  ;;  %s913_s10 = scalar_lea.vmem %s912_s7, 512  ;;  %p914_p10 = scmp.lt.s32.totalorder %s1201_s27, %s912_s7 }
  0x5e   : > { %771 = vmatpush3.bf16.msra.mxu0 %v768_v10  ;;  %v268_v35 = vsel %vm254_vm4, 0.0, %v262_v34  ;;  %p909_p6 = pnand %p908_p4, %p1100_p12  ;;  %p915_p13 = scmp.lt.s32.totalorder %s913_s10, %s907_s30 }
  0x5f   : > { %773 = vmatprep.subr.bf16.mxu0 %v772_v25 }
  0x60   : > { %763 = vmatpush3.bf16.msra.mxu1 %v760_v23  ;;  %p910_p8 = pneg %p909_p6  ;;  %p916_p3 = por %p915_p13, %p914_p10 }
  0x61   : > { %743 = vmatmul.mubr.msk.f32.vlgmr.msra.gmra.mrb[0].mxu0 %vm278_vm1, %v243_v30 }
  0x62   : > { %775 = vmatpush3.bf16.msra.mxu0 %v772_v25  ;;  %753 = vmatprep.mubr.msk.f32.mxu0 %vm278_vm1, %v258_v33  ;;  %p917_p7 = pnand %p916_p3, %p910_p8 }
  0x63   : > { %777 = vmatprep.subr.bf16.mxu0 %v776_v32  ;;  %732 = vmatmul.mubr.msk.f32.vlgmr.msra.gmra.mrb[0].mxu1 %vm278_vm1, %v207_v9 }
  0x66   : > { %779 = vmatpush3.bf16.msra.mxu0 %v776_v32 }
  0x69   : > { %754 = vmatmul.mubr.msk.f32.vlgmr.msra.gmra.mrb[0].mxu0 %vm278_vm1, %v268_v35 }
 0x136   : > { %v733_v36 = vpop.f32.mrb[0].mxu1 }
 0x137   : > { %v349_v37 = vpop.f32.mrb[1].mxu1 }
 0x13c   : > { %v755_v38 = vpop.f32.mrb[0].mxu0 }
 0x13d   : > { %v780_v40 = vadd.f32 %v755_v38, %v733_v36  ;;  %v516_v41 = vpop.f32.mrb[1].mxu0 }
 0x13e   : > { %v781_v42 = vadd.f32 %v516_v41, %v349_v37 }
 0x13f   : > { %v533_v43 = vadd.f32 %v780_v40, %v695_v39 }
 0x140   : > { %v532_v44 = vadd.f32 %v781_v42, %v695_v39 }
 0x141   : > { %v535_v45 = vmax.f32 %v533_v43, 0.0 }
 0x142   : > { %v534_v46 = vmax.f32 %v532_v44, 0.0 }
 0x143   : > { %v537_v49 = vadd.f32 %v535_v45, %v207_v9 }
 0x144   : > { %v536_v47 = vadd.f32 %v534_v46, %v206_v8 }
 0x145   : > { %v541_v50 = vsel %vm278_vm1, %v537_v49, 0.0 }
 0x146   : > { %v538_v48 = vsel %vm278_vm1, %v536_v47, 0.0 }
 0x147   : > { %539 = vadd.xlane.f32.xlu0 %v538_v48 }
 0x14b   : > { %542 = vadd.xlane.f32.xlu0 %v541_v50 }
 0x1d4   : > { %v540_v51 = vpop.xlane.xlu0 %539 }
 0x1d5   : > { %v545_v52 = vmul.f32 0.03125, %v540_v51 }
 0x1d7   : > { %v547_v53 = vsub.f32 %v536_v47, %v545_v52 }
 0x1d8   : > { %v543_v54 = vpop.xlane.xlu0 %542 }
 0x1d9   : > { %v546_v55 = vmul.f32 0.03125, %v543_v54  ;;  %v549_v56 = vmul.f32 %v547_v53, %v547_v53 }
 0x1db   : > { %v548_v57 = vsub.f32 %v537_v49, %v546_v55  ;;  %v551_v58 = vsel %vm278_vm1, %v549_v56, 0.0 }
 0x1dc   : > { %552 = vadd.xlane.f32.xlu1 %v551_v58 }
 0x1dd   : > { %v550_v59 = vmul.f32 %v548_v57, %v548_v57 }
 0x1df   : > { %v554_v60 = vsel %vm278_vm1, %v550_v59, 0.0 }
 0x1e0   : > { %555 = vadd.xlane.f32.xlu1 %v554_v60 }
 0x269   : > { %v553_v61 = vpop.xlane.xlu1 %552 }
 0x26a   : > { %v557_v62 = vmul.f32 0.03125, %v553_v61 }
 0x26c   : > { %v559_v63 = vadd.f32 1e-05, %v557_v62 }
 0x26d   : > { %v556_v0 = vpop.xlane.xlu1 %555 }
 0x26e   : > { %845 = vrsqrt.f32 %v559_v63  ;;  %v558_v1 = vmul.f32 0.03125, %v556_v0 }
 0x270   : > { %v560_v2 = vadd.f32 1e-05, %v558_v1 }
 0x272   : > { %847 = vrsqrt.f32 %v560_v2 }
 0x278   : > { %v846_v3 = vpop.eup %845 }
 0x279   : > { %v563_v5 = vmul.f32 %v846_v3, %v547_v53 }
 0x27b   : > { %v570_v7 = vmul.f32 %v696_v4, %v563_v5 }
 0x27c   : > { %v848_v8 = vpop.eup %847 }
 0x27d   : > { %v577_v9 = vadd.f32 %v697_v6, %v570_v7  ;;  %v564_v10 = vmul.f32 %v848_v8, %v548_v57 }
 0x27f   : > { %v571_v11 = vmul.f32 %v696_v4, %v564_v10  ;;  %579 = vst.msk [vmem:[%s203_s11] sm:$0xff] %vm278_vm1, %v577_v9 }
 0x281   : > { %v578_v12 = vadd.f32 %v697_v6, %v571_v11 }
 0x283   : > { %580 = vst.msk [vmem:[%s203_s11 + $0x8] sm:$0xff] %vm278_vm1, %v578_v12 }
 0x284   : > { %920 = shalt.err (!%p917_p7)
}
 0x285   : > { %s921_s26 = scalar_lea.hbm %s1199_s29, 256  ;;  %s925_s8 = scalar_lea.hbm %s1249_s3, 512 }
 0x286   : > { %p922_p9 = scmp.ne.s32.totalorder %s1199_s29, %s921_s26  ;;  %p926_p5 = scmp.lt.u32.totalorder %s1199_s29, %s1249_s3 }
 0x287   : > { %p927_p11 = scmp.lt.u32.totalorder %s925_s8, %s921_s26  ;;  %p929_p4 = scmp.lt.u32.totalorder %s921_s26, %s1199_s29 }
 0x288   : > { %p923_p1 = pnand %p922_p9, %p1100_p12 }
 0x289   : > { %p928_p2 = por %p927_p11, %p926_p5 }
 0x28a   : > { %p924_p0 = pneg %p923_p1 }
 0x28b   : > { %p930_p6 = por %p929_p4, %p928_p2 }
 0x28d   : > { %p931_p8 = pnand %p930_p6, %p924_p0 }
 0x28f   : > { %934 = shalt.err (!%p931_p8)
}
 0x290   : > { %s984_s25 = smov 128   ;;  %s985_s5 = smov 8  }
 0x291   : > { %790 = dma.vmem_to_hbm [thread:$0]  (%p1100_p12), %s1201_s27, 256, %s1199_s29, %s582_s16, %s984_s25, %s984_s25, %s985_s5  }
 0x292 PF: > { %s610_s11 = sand.u32 1, %s965_s12   ;;  %p1266_p10 = scmp.ne.s32.totalorder %s1254_s19, 0 }
 0x293   : > { %p1267_p13 = scmp.ge.s32.totalorder %s977_s15, 2  ;;  %s611_s28 = scalar_lea.sflag [#allocation4], %s610_s11 }
 0x295   : > { %p801_p3 = pnand %p1267_p13, %p1266_p10 }
 0x297   : > { %960 = dma.done.wait (!%p801_p3), %s611_s28, 256  }
 0x298   : > { %962 = vsyncadd (!%p801_p3), %s611_s28, 4294967040  ;;  %p17_p7 = scmp.ge.s32.totalorder %s1062_s24, 4   ;;  %s1268_s12 = smov %s969_s13 }
 0x299   : > { %s1269_s13 = smov %s973_s14  ;;  %s1270_s14 = smov %s1096_s17 }
 0x29a   : > { %s1271_s15 = smov %s1062_s24  ;;  %19 = sbr.rel (!%p17_p7) target bundleno = 6 (0x6), region = 83 }
 0x2a1   :  { %616 = vsyncpa [#allocation3], 1 }
 0x2a2   :  { %618 = vsyncpa [#allocation3 + $0x1], 1 }
 0x2a3   :  { %619 = vsyncpa [#allocation6], 1 }
 0x2a4   :  { %620 = vsyncpa [#allocation4], 1 }
 0x2a5   :  { %622 = vsyncpa [#allocation4 + $0x1], 1 }

</bundles_post_ra>
